<compile_context>
chip_gen: v7x
topology: tpu7x:2x2x1
jax: 0.10.0
libtpu: 0.0.40
codegen_flags: <defaults>
</compile_context>

<pallas_src>
import math

import jax
import jax.numpy as jnp
from jax.experimental import pallas as pl
from jax.experimental.pallas import tpu as pltpu


def lstm_classifier_kernel(
    xw_ref,     # (T, Bb, 4H)  precomputed x @ W_ih^T + (b_ih + b_hh)
    whh_ref,    # (H, 4H)      hidden->gates weight (pre-transposed)
    wff_ref,    # (H, F)       hidden2ff weight (pre-transposed)
    bff_ref,    # (1, F)
    wlab_ref,   # (F, L)       ff2label weight (pre-transposed)
    blab_ref,   # (1, L)
    out_ref,    # (Bb, L)      sigmoid(ff2label(hidden2ff(h_T)))
):
    T, Bb, _ = xw_ref.shape
    H = whh_ref.shape[0]

    # Hoist the recurrent weight load out of the loop (loaded once, stays in
    # vregs / VMEM-resident; no per-step ref traffic beyond the xw slice).
    whh = whh_ref[...]

    def step(t, carry):
        h, c = carry
        # gates: (Bb, 4H). Only one MXU matmul per step on the serial path;
        # the x-projection and bias are already folded into xw.
        gates = xw_ref[t] + jnp.dot(h, whh, preferred_element_type=jnp.float32)

        # TODO(synk): gate slices are 32-lane sub-slices of a 128-lane vreg
        # (H=32); at large H, pad/reorder gate columns to lane-aligned slabs.
        i_g = jax.nn.sigmoid(gates[:, 0 * H:1 * H])
        f_g = jax.nn.sigmoid(gates[:, 1 * H:2 * H])
        g_g = jnp.tanh(gates[:, 2 * H:3 * H])
        o_g = jax.nn.sigmoid(gates[:, 3 * H:4 * H])

        c_new = f_g * c + i_g * g_g
        h_new = o_g * jnp.tanh(c_new)
        return h_new, c_new

    h0 = jnp.zeros((Bb, H), jnp.float32)
    c0 = jnp.zeros((Bb, H), jnp.float32)
    # State carried in vregs across the (fully unrolled, LLO-visible) loop.
    h, _c = jax.lax.fori_loop(0, T, step, (h0, c0), unroll=True)

    # dropout is identity in eval mode
    ff = jnp.dot(h, wff_ref[...], preferred_element_type=jnp.float32) + bff_ref[...]
    logits = (
        jnp.dot(ff, wlab_ref[...], preferred_element_type=jnp.float32) + blab_ref[...]
    )
    out_ref[...] = jax.nn.sigmoid(logits).astype(out_ref.dtype)


def lstm_classifier_forward(x, params, *, batch_block=None):
    """x: (B, T, D) float32.  Returns (B, label_size) float32."""
    B, T, D = x.shape
    w_ih = params["w_ih"]     # (4H, D)  torch layout
    w_hh = params["w_hh"]     # (4H, H)
    b_ih = params["b_ih"]     # (4H,)
    b_hh = params["b_hh"]     # (4H,)
    w_ff = params["w_ff"]     # (F, H)
    b_ff = params["b_ff"]     # (F,)
    w_lab = params["w_lab"]   # (L, F)
    b_lab = params["b_lab"]   # (L,)

    H = w_hh.shape[1]
    F = w_ff.shape[0]
    L = w_lab.shape[0]

    # Batch-block grid: one block for small B; a multiple-of-8 block size
    # enables megacore (v7x) sharding over batch at real batch sizes.
    if batch_block is None:
        batch_block = B
    assert B % batch_block == 0
    assert batch_block == B or batch_block % 8 == 0
    num_blocks = B // batch_block

    # ---- Hoisted input projection (one lane-dense matmul, bias fused once) ----
    # xw[t, b, :] = x[b, t, :] @ W_ih^T + (b_ih + b_hh)   -> (T, B, 4H)
    wih_t = jnp.transpose(w_ih)                                  # (D, 4H)
    bias = (b_ih + b_hh).astype(jnp.float32)                     # (4H,)
    xw = jnp.einsum(
        "btd,dg->tbg", x.astype(jnp.float32), wih_t,
        preferred_element_type=jnp.float32,
    ) + bias[None, None, :]                                      # (T, B, 4H)

    whh_t = jnp.transpose(w_hh)                                  # (H, 4H)
    wff_t = jnp.transpose(w_ff)                                  # (H, F)
    bff = b_ff.reshape(1, F)
    wlab_t = jnp.transpose(w_lab)                                # (F, L)
    blab = b_lab.reshape(1, L)

    grid_spec = pltpu.PrefetchScalarGridSpec(
        num_scalar_prefetch=0,
        grid=(num_blocks,),
        in_specs=[
            pl.BlockSpec((T, batch_block, 4 * H), lambda b: (0, b, 0)),  # xw
            pl.BlockSpec((H, 4 * H), lambda b: (0, 0)),                  # w_hh^T
            pl.BlockSpec((H, F), lambda b: (0, 0)),                      # w_ff^T
            pl.BlockSpec((1, F), lambda b: (0, 0)),                      # b_ff
            pl.BlockSpec((F, L), lambda b: (0, 0)),                      # w_lab^T
            pl.BlockSpec((1, L), lambda b: (0, 0)),                      # b_lab
        ],
        out_specs=pl.BlockSpec((batch_block, L), lambda b: (b, 0)),
    )

    return pl.pallas_call(
        lstm_classifier_kernel,
        out_shape=jax.ShapeDtypeStruct((B, L), jnp.float32),
        grid_spec=grid_spec,
        compiler_params=pltpu.CompilerParams(
            # Batch blocks are independent -> megacore-shardable on v7x.
            dimension_semantics=("parallel",),
        ),
    )(xw, whh_t, wff_t, bff, wlab_t, blab)


def _xavier_normal(key, shape):
    fan_out, fan_in = shape
    std = math.sqrt(2.0 / (fan_in + fan_out))
    return std * jax.random.normal(key, shape, dtype=jnp.float32)


def init_params(key, input_dim, hidden_dim, label_size):
    ff_dim = int(math.sqrt(hidden_dim))
    k = jax.random.split(key, 4)
    return {
        "w_ih": _xavier_normal(k[0], (4 * hidden_dim, input_dim)),
        "w_hh": _xavier_normal(k[1], (4 * hidden_dim, hidden_dim)),
        "b_ih": jnp.full((4 * hidden_dim,), 1e-4, jnp.float32),
        "b_hh": jnp.full((4 * hidden_dim,), 1e-4, jnp.float32),
        "w_ff": _xavier_normal(k[2], (ff_dim, hidden_dim)),
        "b_ff": jnp.full((ff_dim,), 1e-4, jnp.float32),
        "w_lab": _xavier_normal(k[3], (label_size, ff_dim)),
        "b_lab": jnp.full((label_size,), 1e-4, jnp.float32),
    }


def reference_forward(x, params):
    """Pure-JAX reference matching torch.nn.LSTMCell + Linear + sigmoid."""
    B, T, D = x.shape
    H = params["w_hh"].shape[1]
    h = jnp.zeros((B, H), jnp.float32)
    c = jnp.zeros((B, H), jnp.float32)
    for t in range(T):
        gates = (x[:, t] @ params["w_ih"].T + params["b_ih"]
                 + h @ params["w_hh"].T + params["b_hh"])
        i_g = jax.nn.sigmoid(gates[:, 0 * H:1 * H])
        f_g = jax.nn.sigmoid(gates[:, 1 * H:2 * H])
        g_g = jnp.tanh(gates[:, 2 * H:3 * H])
        o_g = jax.nn.sigmoid(gates[:, 3 * H:4 * H])
        c = f_g * c + i_g * g_g
        h = o_g * jnp.tanh(c)
    ff = h @ params["w_ff"].T + params["b_ff"]
    return jax.nn.sigmoid(ff @ params["w_lab"].T + params["b_lab"])


if __name__ == "__main__":
    B, T, D = 8, 8, 16          # batch, seq len, input_dim
    H, L = 32, 4                # hidden_dim, label_size

    key = jax.random.PRNGKey(0)
    kx, kp = jax.random.split(key)
    x = jax.random.normal(kx, (B, T, D), dtype=jnp.float32)
    params = init_params(kp, D, H, L)

    out = lstm_classifier_forward(x, params)
    out = jax.block_until_ready(out)

    ref = reference_forward(x, params)
    assert out.shape == (B, L)
    assert jnp.allclose(out, ref, atol=1e-5, rtol=1e-5), (out, ref)

    print("KERNEL_OK")
</pallas_src>

<mosaic_0001>
module attributes {stable_mosaic.version = 11 : i64} {
  func.func @lstm_classifier_kernel(%arg0: i32, %arg1: memref<8x8x128xf32, #tpu.memory_space<vmem>>, %arg2: memref<32x128xf32, #tpu.memory_space<vmem>>, %arg3: memref<32x5xf32, #tpu.memory_space<vmem>>, %arg4: memref<1x5xf32, #tpu.memory_space<vmem>>, %arg5: memref<5x4xf32, #tpu.memory_space<vmem>>, %arg6: memref<1x4xf32, #tpu.memory_space<vmem>>, %arg7: memref<8x4xf32, #tpu.memory_space<vmem>>) attributes {dimension_semantics = [#tpu.dimension_semantics<parallel>], iteration_bounds = array<i64: 1>, scalar_prefetch = 0 : i64, scratch_operands = 0 : i64, tpu.core_type = #tpu.core_type<tc>, window_params = [{transform_indices = @transform_0, window_bounds = array<i64: 8, 8, 128>}, {pipeline_mode = #tpu.pipeline_mode<synchronous>, transform_indices = @transform_1, window_bounds = array<i64: 32, 128>}, {pipeline_mode = #tpu.pipeline_mode<synchronous>, transform_indices = @transform_2, window_bounds = array<i64: 32, 5>}, {pipeline_mode = #tpu.pipeline_mode<synchronous>, transform_indices = @transform_3, window_bounds = array<i64: 1, 5>}, {pipeline_mode = #tpu.pipeline_mode<synchronous>, transform_indices = @transform_4, window_bounds = array<i64: 5, 4>}, {pipeline_mode = #tpu.pipeline_mode<synchronous>, transform_indices = @transform_5, window_bounds = array<i64: 1, 4>}, {transform_indices = @transform_6, window_bounds = array<i64: 8, 4>}]} {
    %c0 = arith.constant 0 : index
    %c0_0 = arith.constant 0 : index
    %0 = vector.load %arg2[%c0, %c0_0] : memref<32x128xf32, #tpu.memory_space<vmem>>, vector<32x128xf32>
    %cst = arith.constant 0.000000e+00 : f32
    %1 = vector.broadcast %cst : f32 to vector<8x32xf32>
    %cst_1 = arith.constant 0.000000e+00 : f32
    %2 = vector.broadcast %cst_1 : f32 to vector<8x32xf32>
    %c0_i32 = arith.constant 0 : i32
    %3 = arith.index_cast %c0_i32 : i32 to index
    %c0_2 = arith.constant 0 : index
    %c0_3 = arith.constant 0 : index
    %4 = vector.load %arg1[%3, %c0_2, %c0_3] : memref<8x8x128xf32, #tpu.memory_space<vmem>>, vector<1x8x128xf32>
    %5 = vector.shape_cast %4 : vector<1x8x128xf32> to vector<8x128xf32>
    %cst_4 = arith.constant dense<0.000000e+00> : vector<8x128xf32>
    %6 = tpu.matmul %1, %0, %cst_4 {dimension_numbers = #tpu.dot_dimension_numbers<[1], [0], [0], [1], [0, 0, 1, 1], [], []>} : vector<8x32xf32>, vector<32x128xf32>, vector<8x128xf32> -> vector<8x128xf32>
    %7 = arith.addf %5, %6 : vector<8x128xf32>
    %8 = vector.extract_strided_slice %7 {offsets = [0, 0], sizes = [8, 32], strides = [1, 1]} : vector<8x128xf32> to vector<8x32xf32>
    %9 = arith.negf %8 : vector<8x32xf32>
    %10 = math.exp %9 : vector<8x32xf32>
    %cst_5 = arith.constant 1.000000e+00 : f32
    %11 = vector.broadcast %cst_5 : f32 to vector<8x32xf32>
    %12 = arith.addf %11, %10 : vector<8x32xf32>
    %13 = arith.divf %11, %12 : vector<8x32xf32>
    %14 = vector.extract_strided_slice %7 {offsets = [0, 32], sizes = [8, 32], strides = [1, 1]} : vector<8x128xf32> to vector<8x32xf32>
    %15 = arith.negf %14 : vector<8x32xf32>
    %16 = math.exp %15 : vector<8x32xf32>
    %cst_6 = arith.constant 1.000000e+00 : f32
    %17 = vector.broadcast %cst_6 : f32 to vector<8x32xf32>
    %18 = arith.addf %17, %16 : vector<8x32xf32>
    %19 = arith.divf %17, %18 : vector<8x32xf32>
    %20 = vector.extract_strided_slice %7 {offsets = [0, 64], sizes = [8, 32], strides = [1, 1]} : vector<8x128xf32> to vector<8x32xf32>
    %21 = math.tanh %20 : vector<8x32xf32>
    %22 = vector.extract_strided_slice %7 {offsets = [0, 96], sizes = [8, 32], strides = [1, 1]} : vector<8x128xf32> to vector<8x32xf32>
    %23 = arith.negf %22 : vector<8x32xf32>
    %24 = math.exp %23 : vector<8x32xf32>
    %cst_7 = arith.constant 1.000000e+00 : f32
    %25 = vector.broadcast %cst_7 : f32 to vector<8x32xf32>
    %26 = arith.addf %25, %24 : vector<8x32xf32>
    %27 = arith.divf %25, %26 : vector<8x32xf32>
    %28 = arith.mulf %19, %2 : vector<8x32xf32>
    %29 = arith.mulf %13, %21 : vector<8x32xf32>
    %30 = arith.addf %28, %29 : vector<8x32xf32>
    %31 = math.tanh %30 : vector<8x32xf32>
    %32 = arith.mulf %27, %31 : vector<8x32xf32>
    %c1_i32 = arith.constant 1 : i32
    %33 = arith.index_cast %c1_i32 : i32 to index
    %c0_8 = arith.constant 0 : index
    %c0_9 = arith.constant 0 : index
    %34 = vector.load %arg1[%33, %c0_8, %c0_9] : memref<8x8x128xf32, #tpu.memory_space<vmem>>, vector<1x8x128xf32>
    %35 = vector.shape_cast %34 : vector<1x8x128xf32> to vector<8x128xf32>
    %cst_10 = arith.constant dense<0.000000e+00> : vector<8x128xf32>
    %36 = tpu.matmul %32, %0, %cst_10 {dimension_numbers = #tpu.dot_dimension_numbers<[1], [0], [0], [1], [0, 0, 1, 1], [], []>} : vector<8x32xf32>, vector<32x128xf32>, vector<8x128xf32> -> vector<8x128xf32>
    %37 = arith.addf %35, %36 : vector<8x128xf32>
    %38 = vector.extract_strided_slice %37 {offsets = [0, 0], sizes = [8, 32], strides = [1, 1]} : vector<8x128xf32> to vector<8x32xf32>
    %39 = arith.negf %38 : vector<8x32xf32>
    %40 = math.exp %39 : vector<8x32xf32>
    %cst_11 = arith.constant 1.000000e+00 : f32
    %41 = vector.broadcast %cst_11 : f32 to vector<8x32xf32>
    %42 = arith.addf %41, %40 : vector<8x32xf32>
    %43 = arith.divf %41, %42 : vector<8x32xf32>
    %44 = vector.extract_strided_slice %37 {offsets = [0, 32], sizes = [8, 32], strides = [1, 1]} : vector<8x128xf32> to vector<8x32xf32>
    %45 = arith.negf %44 : vector<8x32xf32>
    %46 = math.exp %45 : vector<8x32xf32>
    %cst_12 = arith.constant 1.000000e+00 : f32
    %47 = vector.broadcast %cst_12 : f32 to vector<8x32xf32>
    %48 = arith.addf %47, %46 : vector<8x32xf32>
    %49 = arith.divf %47, %48 : vector<8x32xf32>
    %50 = vector.extract_strided_slice %37 {offsets = [0, 64], sizes = [8, 32], strides = [1, 1]} : vector<8x128xf32> to vector<8x32xf32>
    %51 = math.tanh %50 : vector<8x32xf32>
    %52 = vector.extract_strided_slice %37 {offsets = [0, 96], sizes = [8, 32], strides = [1, 1]} : vector<8x128xf32> to vector<8x32xf32>
    %53 = arith.negf %52 : vector<8x32xf32>
    %54 = math.exp %53 : vector<8x32xf32>
    %cst_13 = arith.constant 1.000000e+00 : f32
    %55 = vector.broadcast %cst_13 : f32 to vector<8x32xf32>
    %56 = arith.addf %55, %54 : vector<8x32xf32>
    %57 = arith.divf %55, %56 : vector<8x32xf32>
    %58 = arith.mulf %49, %30 : vector<8x32xf32>
    %59 = arith.mulf %43, %51 : vector<8x32xf32>
    %60 = arith.addf %58, %59 : vector<8x32xf32>
    %61 = math.tanh %60 : vector<8x32xf32>
    %62 = arith.mulf %57, %61 : vector<8x32xf32>
    %c2_i32 = arith.constant 2 : i32
    %63 = arith.index_cast %c2_i32 : i32 to index
    %c0_14 = arith.constant 0 : index
    %c0_15 = arith.constant 0 : index
    %64 = vector.load %arg1[%63, %c0_14, %c0_15] : memref<8x8x128xf32, #tpu.memory_space<vmem>>, vector<1x8x128xf32>
    %65 = vector.shape_cast %64 : vector<1x8x128xf32> to vector<8x128xf32>
    %cst_16 = arith.constant dense<0.000000e+00> : vector<8x128xf32>
    %66 = tpu.matmul %62, %0, %cst_16 {dimension_numbers = #tpu.dot_dimension_numbers<[1], [0], [0], [1], [0, 0, 1, 1], [], []>} : vector<8x32xf32>, vector<32x128xf32>, vector<8x128xf32> -> vector<8x128xf32>
    %67 = arith.addf %65, %66 : vector<8x128xf32>
    %68 = vector.extract_strided_slice %67 {offsets = [0, 0], sizes = [8, 32], strides = [1, 1]} : vector<8x128xf32> to vector<8x32xf32>
    %69 = arith.negf %68 : vector<8x32xf32>
    %70 = math.exp %69 : vector<8x32xf32>
    %cst_17 = arith.constant 1.000000e+00 : f32
    %71 = vector.broadcast %cst_17 : f32 to vector<8x32xf32>
    %72 = arith.addf %71, %70 : vector<8x32xf32>
    %73 = arith.divf %71, %72 : vector<8x32xf32>
    %74 = vector.extract_strided_slice %67 {offsets = [0, 32], sizes = [8, 32], strides = [1, 1]} : vector<8x128xf32> to vector<8x32xf32>
    %75 = arith.negf %74 : vector<8x32xf32>
    %76 = math.exp %75 : vector<8x32xf32>
    %cst_18 = arith.constant 1.000000e+00 : f32
    %77 = vector.broadcast %cst_18 : f32 to vector<8x32xf32>
    %78 = arith.addf %77, %76 : vector<8x32xf32>
    %79 = arith.divf %77, %78 : vector<8x32xf32>
    %80 = vector.extract_strided_slice %67 {offsets = [0, 64], sizes = [8, 32], strides = [1, 1]} : vector<8x128xf32> to vector<8x32xf32>
    %81 = math.tanh %80 : vector<8x32xf32>
    %82 = vector.extract_strided_slice %67 {offsets = [0, 96], sizes = [8, 32], strides = [1, 1]} : vector<8x128xf32> to vector<8x32xf32>
    %83 = arith.negf %82 : vector<8x32xf32>
    %84 = math.exp %83 : vector<8x32xf32>
    %cst_19 = arith.constant 1.000000e+00 : f32
    %85 = vector.broadcast %cst_19 : f32 to vector<8x32xf32>
    %86 = arith.addf %85, %84 : vector<8x32xf32>
    %87 = arith.divf %85, %86 : vector<8x32xf32>
    %88 = arith.mulf %79, %60 : vector<8x32xf32>
    %89 = arith.mulf %73, %81 : vector<8x32xf32>
    %90 = arith.addf %88, %89 : vector<8x32xf32>
    %91 = math.tanh %90 : vector<8x32xf32>
    %92 = arith.mulf %87, %91 : vector<8x32xf32>
    %c3_i32 = arith.constant 3 : i32
    %93 = arith.index_cast %c3_i32 : i32 to index
    %c0_20 = arith.constant 0 : index
    %c0_21 = arith.constant 0 : index
    %94 = vector.load %arg1[%93, %c0_20, %c0_21] : memref<8x8x128xf32, #tpu.memory_space<vmem>>, vector<1x8x128xf32>
    %95 = vector.shape_cast %94 : vector<1x8x128xf32> to vector<8x128xf32>
    %cst_22 = arith.constant dense<0.000000e+00> : vector<8x128xf32>
    %96 = tpu.matmul %92, %0, %cst_22 {dimension_numbers = #tpu.dot_dimension_numbers<[1], [0], [0], [1], [0, 0, 1, 1], [], []>} : vector<8x32xf32>, vector<32x128xf32>, vector<8x128xf32> -> vector<8x128xf32>
    %97 = arith.addf %95, %96 : vector<8x128xf32>
    %98 = vector.extract_strided_slice %97 {offsets = [0, 0], sizes = [8, 32], strides = [1, 1]} : vector<8x128xf32> to vector<8x32xf32>
    %99 = arith.negf %98 : vector<8x32xf32>
    %100 = math.exp %99 : vector<8x32xf32>
    %cst_23 = arith.constant 1.000000e+00 : f32
    %101 = vector.broadcast %cst_23 : f32 to vector<8x32xf32>
    %102 = arith.addf %101, %100 : vector<8x32xf32>
    %103 = arith.divf %101, %102 : vector<8x32xf32>
    %104 = vector.extract_strided_slice %97 {offsets = [0, 32], sizes = [8, 32], strides = [1, 1]} : vector<8x128xf32> to vector<8x32xf32>
    %105 = arith.negf %104 : vector<8x32xf32>
    %106 = math.exp %105 : vector<8x32xf32>
    %cst_24 = arith.constant 1.000000e+00 : f32
    %107 = vector.broadcast %cst_24 : f32 to vector<8x32xf32>
    %108 = arith.addf %107, %106 : vector<8x32xf32>
    %109 = arith.divf %107, %108 : vector<8x32xf32>
    %110 = vector.extract_strided_slice %97 {offsets = [0, 64], sizes = [8, 32], strides = [1, 1]} : vector<8x128xf32> to vector<8x32xf32>
    %111 = math.tanh %110 : vector<8x32xf32>
    %112 = vector.extract_strided_slice %97 {offsets = [0, 96], sizes = [8, 32], strides = [1, 1]} : vector<8x128xf32> to vector<8x32xf32>
    %113 = arith.negf %112 : vector<8x32xf32>
    %114 = math.exp %113 : vector<8x32xf32>
    %cst_25 = arith.constant 1.000000e+00 : f32
    %115 = vector.broadcast %cst_25 : f32 to vector<8x32xf32>
    %116 = arith.addf %115, %114 : vector<8x32xf32>
    %117 = arith.divf %115, %116 : vector<8x32xf32>
    %118 = arith.mulf %109, %90 : vector<8x32xf32>
    %119 = arith.mulf %103, %111 : vector<8x32xf32>
    %120 = arith.addf %118, %119 : vector<8x32xf32>
    %121 = math.tanh %120 : vector<8x32xf32>
    %122 = arith.mulf %117, %121 : vector<8x32xf32>
    %c4_i32 = arith.constant 4 : i32
    %123 = arith.index_cast %c4_i32 : i32 to index
    %c0_26 = arith.constant 0 : index
    %c0_27 = arith.constant 0 : index
    %124 = vector.load %arg1[%123, %c0_26, %c0_27] : memref<8x8x128xf32, #tpu.memory_space<vmem>>, vector<1x8x128xf32>
    %125 = vector.shape_cast %124 : vector<1x8x128xf32> to vector<8x128xf32>
    %cst_28 = arith.constant dense<0.000000e+00> : vector<8x128xf32>
    %126 = tpu.matmul %122, %0, %cst_28 {dimension_numbers = #tpu.dot_dimension_numbers<[1], [0], [0], [1], [0, 0, 1, 1], [], []>} : vector<8x32xf32>, vector<32x128xf32>, vector<8x128xf32> -> vector<8x128xf32>
    %127 = arith.addf %125, %126 : vector<8x128xf32>
    %128 = vector.extract_strided_slice %127 {offsets = [0, 0], sizes = [8, 32], strides = [1, 1]} : vector<8x128xf32> to vector<8x32xf32>
    %129 = arith.negf %128 : vector<8x32xf32>
    %130 = math.exp %129 : vector<8x32xf32>
    %cst_29 = arith.constant 1.000000e+00 : f32
    %131 = vector.broadcast %cst_29 : f32 to vector<8x32xf32>
    %132 = arith.addf %131, %130 : vector<8x32xf32>
    %133 = arith.divf %131, %132 : vector<8x32xf32>
    %134 = vector.extract_strided_slice %127 {offsets = [0, 32], sizes = [8, 32], strides = [1, 1]} : vector<8x128xf32> to vector<8x32xf32>
    %135 = arith.negf %134 : vector<8x32xf32>
    %136 = math.exp %135 : vector<8x32xf32>
    %cst_30 = arith.constant 1.000000e+00 : f32
    %137 = vector.broadcast %cst_30 : f32 to vector<8x32xf32>
    %138 = arith.addf %137, %136 : vector<8x32xf32>
    %139 = arith.divf %137, %138 : vector<8x32xf32>
    %140 = vector.extract_strided_slice %127 {offsets = [0, 64], sizes = [8, 32], strides = [1, 1]} : vector<8x128xf32> to vector<8x32xf32>
    %141 = math.tanh %140 : vector<8x32xf32>
    %142 = vector.extract_strided_slice %127 {offsets = [0, 96], sizes = [8, 32], strides = [1, 1]} : vector<8x128xf32> to vector<8x32xf32>
    %143 = arith.negf %142 : vector<8x32xf32>
    %144 = math.exp %143 : vector<8x32xf32>
    %cst_31 = arith.constant 1.000000e+00 : f32
    %145 = vector.broadcast %cst_31 : f32 to vector<8x32xf32>
    %146 = arith.addf %145, %144 : vector<8x32xf32>
    %147 = arith.divf %145, %146 : vector<8x32xf32>
    %148 = arith.mulf %139, %120 : vector<8x32xf32>
    %149 = arith.mulf %133, %141 : vector<8x32xf32>
    %150 = arith.addf %148, %149 : vector<8x32xf32>
    %151 = math.tanh %150 : vector<8x32xf32>
    %152 = arith.mulf %147, %151 : vector<8x32xf32>
    %c5_i32 = arith.constant 5 : i32
    %153 = arith.index_cast %c5_i32 : i32 to index
    %c0_32 = arith.constant 0 : index
    %c0_33 = arith.constant 0 : index
    %154 = vector.load %arg1[%153, %c0_32, %c0_33] : memref<8x8x128xf32, #tpu.memory_space<vmem>>, vector<1x8x128xf32>
    %155 = vector.shape_cast %154 : vector<1x8x128xf32> to vector<8x128xf32>
    %cst_34 = arith.constant dense<0.000000e+00> : vector<8x128xf32>
    %156 = tpu.matmul %152, %0, %cst_34 {dimension_numbers = #tpu.dot_dimension_numbers<[1], [0], [0], [1], [0, 0, 1, 1], [], []>} : vector<8x32xf32>, vector<32x128xf32>, vector<8x128xf32> -> vector<8x128xf32>
    %157 = arith.addf %155, %156 : vector<8x128xf32>
    %158 = vector.extract_strided_slice %157 {offsets = [0, 0], sizes = [8, 32], strides = [1, 1]} : vector<8x128xf32> to vector<8x32xf32>
    %159 = arith.negf %158 : vector<8x32xf32>
    %160 = math.exp %159 : vector<8x32xf32>
    %cst_35 = arith.constant 1.000000e+00 : f32
    %161 = vector.broadcast %cst_35 : f32 to vector<8x32xf32>
    %162 = arith.addf %161, %160 : vector<8x32xf32>
    %163 = arith.divf %161, %162 : vector<8x32xf32>
    %164 = vector.extract_strided_slice %157 {offsets = [0, 32], sizes = [8, 32], strides = [1, 1]} : vector<8x128xf32> to vector<8x32xf32>
    %165 = arith.negf %164 : vector<8x32xf32>
    %166 = math.exp %165 : vector<8x32xf32>
    %cst_36 = arith.constant 1.000000e+00 : f32
    %167 = vector.broadcast %cst_36 : f32 to vector<8x32xf32>
    %168 = arith.addf %167, %166 : vector<8x32xf32>
    %169 = arith.divf %167, %168 : vector<8x32xf32>
    %170 = vector.extract_strided_slice %157 {offsets = [0, 64], sizes = [8, 32], strides = [1, 1]} : vector<8x128xf32> to vector<8x32xf32>
    %171 = math.tanh %170 : vector<8x32xf32>
    %172 = vector.extract_strided_slice %157 {offsets = [0, 96], sizes = [8, 32], strides = [1, 1]} : vector<8x128xf32> to vector<8x32xf32>
    %173 = arith.negf %172 : vector<8x32xf32>
    %174 = math.exp %173 : vector<8x32xf32>
    %cst_37 = arith.constant 1.000000e+00 : f32
    %175 = vector.broadcast %cst_37 : f32 to vector<8x32xf32>
    %176 = arith.addf %175, %174 : vector<8x32xf32>
    %177 = arith.divf %175, %176 : vector<8x32xf32>
    %178 = arith.mulf %169, %150 : vector<8x32xf32>
    %179 = arith.mulf %163, %171 : vector<8x32xf32>
    %180 = arith.addf %178, %179 : vector<8x32xf32>
    %181 = math.tanh %180 : vector<8x32xf32>
    %182 = arith.mulf %177, %181 : vector<8x32xf32>
    %c6_i32 = arith.constant 6 : i32
    %183 = arith.index_cast %c6_i32 : i32 to index
    %c0_38 = arith.constant 0 : index
    %c0_39 = arith.constant 0 : index
    %184 = vector.load %arg1[%183, %c0_38, %c0_39] : memref<8x8x128xf32, #tpu.memory_space<vmem>>, vector<1x8x128xf32>
    %185 = vector.shape_cast %184 : vector<1x8x128xf32> to vector<8x128xf32>
    %cst_40 = arith.constant dense<0.000000e+00> : vector<8x128xf32>
    %186 = tpu.matmul %182, %0, %cst_40 {dimension_numbers = #tpu.dot_dimension_numbers<[1], [0], [0], [1], [0, 0, 1, 1], [], []>} : vector<8x32xf32>, vector<32x128xf32>, vector<8x128xf32> -> vector<8x128xf32>
    %187 = arith.addf %185, %186 : vector<8x128xf32>
    %188 = vector.extract_strided_slice %187 {offsets = [0, 0], sizes = [8, 32], strides = [1, 1]} : vector<8x128xf32> to vector<8x32xf32>
    %189 = arith.negf %188 : vector<8x32xf32>
    %190 = math.exp %189 : vector<8x32xf32>
    %cst_41 = arith.constant 1.000000e+00 : f32
    %191 = vector.broadcast %cst_41 : f32 to vector<8x32xf32>
    %192 = arith.addf %191, %190 : vector<8x32xf32>
    %193 = arith.divf %191, %192 : vector<8x32xf32>
    %194 = vector.extract_strided_slice %187 {offsets = [0, 32], sizes = [8, 32], strides = [1, 1]} : vector<8x128xf32> to vector<8x32xf32>
    %195 = arith.negf %194 : vector<8x32xf32>
    %196 = math.exp %195 : vector<8x32xf32>
    %cst_42 = arith.constant 1.000000e+00 : f32
    %197 = vector.broadcast %cst_42 : f32 to vector<8x32xf32>
    %198 = arith.addf %197, %196 : vector<8x32xf32>
    %199 = arith.divf %197, %198 : vector<8x32xf32>
    %200 = vector.extract_strided_slice %187 {offsets = [0, 64], sizes = [8, 32], strides = [1, 1]} : vector<8x128xf32> to vector<8x32xf32>
    %201 = math.tanh %200 : vector<8x32xf32>
    %202 = vector.extract_strided_slice %187 {offsets = [0, 96], sizes = [8, 32], strides = [1, 1]} : vector<8x128xf32> to vector<8x32xf32>
    %203 = arith.negf %202 : vector<8x32xf32>
    %204 = math.exp %203 : vector<8x32xf32>
    %cst_43 = arith.constant 1.000000e+00 : f32
    %205 = vector.broadcast %cst_43 : f32 to vector<8x32xf32>
    %206 = arith.addf %205, %204 : vector<8x32xf32>
    %207 = arith.divf %205, %206 : vector<8x32xf32>
    %208 = arith.mulf %199, %180 : vector<8x32xf32>
    %209 = arith.mulf %193, %201 : vector<8x32xf32>
    %210 = arith.addf %208, %209 : vector<8x32xf32>
    %211 = math.tanh %210 : vector<8x32xf32>
    %212 = arith.mulf %207, %211 : vector<8x32xf32>
    %c7_i32 = arith.constant 7 : i32
    %213 = arith.index_cast %c7_i32 : i32 to index
    %c0_44 = arith.constant 0 : index
    %c0_45 = arith.constant 0 : index
    %214 = vector.load %arg1[%213, %c0_44, %c0_45] : memref<8x8x128xf32, #tpu.memory_space<vmem>>, vector<1x8x128xf32>
    %215 = vector.shape_cast %214 : vector<1x8x128xf32> to vector<8x128xf32>
    %cst_46 = arith.constant dense<0.000000e+00> : vector<8x128xf32>
    %216 = tpu.matmul %212, %0, %cst_46 {dimension_numbers = #tpu.dot_dimension_numbers<[1], [0], [0], [1], [0, 0, 1, 1], [], []>} : vector<8x32xf32>, vector<32x128xf32>, vector<8x128xf32> -> vector<8x128xf32>
    %217 = arith.addf %215, %216 : vector<8x128xf32>
    %218 = vector.extract_strided_slice %217 {offsets = [0, 0], sizes = [8, 32], strides = [1, 1]} : vector<8x128xf32> to vector<8x32xf32>
    %219 = arith.negf %218 : vector<8x32xf32>
    %220 = math.exp %219 : vector<8x32xf32>
    %cst_47 = arith.constant 1.000000e+00 : f32
    %221 = vector.broadcast %cst_47 : f32 to vector<8x32xf32>
    %222 = arith.addf %221, %220 : vector<8x32xf32>
    %223 = arith.divf %221, %222 : vector<8x32xf32>
    %224 = vector.extract_strided_slice %217 {offsets = [0, 32], sizes = [8, 32], strides = [1, 1]} : vector<8x128xf32> to vector<8x32xf32>
    %225 = arith.negf %224 : vector<8x32xf32>
    %226 = math.exp %225 : vector<8x32xf32>
    %cst_48 = arith.constant 1.000000e+00 : f32
    %227 = vector.broadcast %cst_48 : f32 to vector<8x32xf32>
    %228 = arith.addf %227, %226 : vector<8x32xf32>
    %229 = arith.divf %227, %228 : vector<8x32xf32>
    %230 = vector.extract_strided_slice %217 {offsets = [0, 64], sizes = [8, 32], strides = [1, 1]} : vector<8x128xf32> to vector<8x32xf32>
    %231 = math.tanh %230 : vector<8x32xf32>
    %232 = vector.extract_strided_slice %217 {offsets = [0, 96], sizes = [8, 32], strides = [1, 1]} : vector<8x128xf32> to vector<8x32xf32>
    %233 = arith.negf %232 : vector<8x32xf32>
    %234 = math.exp %233 : vector<8x32xf32>
    %cst_49 = arith.constant 1.000000e+00 : f32
    %235 = vector.broadcast %cst_49 : f32 to vector<8x32xf32>
    %236 = arith.addf %235, %234 : vector<8x32xf32>
    %237 = arith.divf %235, %236 : vector<8x32xf32>
    %238 = arith.mulf %229, %210 : vector<8x32xf32>
    %239 = arith.mulf %223, %231 : vector<8x32xf32>
    %240 = arith.addf %238, %239 : vector<8x32xf32>
    %241 = math.tanh %240 : vector<8x32xf32>
    %242 = arith.mulf %237, %241 : vector<8x32xf32>
    %c8_i32 = arith.constant 8 : i32
    %c0_50 = arith.constant 0 : index
    %c0_51 = arith.constant 0 : index
    %243 = vector.load %arg3[%c0_50, %c0_51] : memref<32x5xf32, #tpu.memory_space<vmem>>, vector<32x5xf32>
    %cst_52 = arith.constant dense<0.000000e+00> : vector<8x5xf32>
    %244 = tpu.matmul %242, %243, %cst_52 {dimension_numbers = #tpu.dot_dimension_numbers<[1], [0], [0], [1], [0, 0, 1, 1], [], []>} : vector<8x32xf32>, vector<32x5xf32>, vector<8x5xf32> -> vector<8x5xf32>
    %c0_53 = arith.constant 0 : index
    %c0_54 = arith.constant 0 : index
    %245 = vector.load %arg4[%c0_53, %c0_54] : memref<1x5xf32, #tpu.memory_space<vmem>>, vector<1x5xf32>
    %246 = vector.broadcast %245 : vector<1x5xf32> to vector<8x5xf32>
    %247 = arith.addf %244, %246 : vector<8x5xf32>
    %c0_55 = arith.constant 0 : index
    %c0_56 = arith.constant 0 : index
    %248 = vector.load %arg5[%c0_55, %c0_56] : memref<5x4xf32, #tpu.memory_space<vmem>>, vector<5x4xf32>
    %cst_57 = arith.constant dense<0.000000e+00> : vector<8x4xf32>
    %249 = tpu.matmul %247, %248, %cst_57 {dimension_numbers = #tpu.dot_dimension_numbers<[1], [0], [0], [1], [0, 0, 1, 1], [], []>} : vector<8x5xf32>, vector<5x4xf32>, vector<8x4xf32> -> vector<8x4xf32>
    %c0_58 = arith.constant 0 : index
    %c0_59 = arith.constant 0 : index
    %250 = vector.load %arg6[%c0_58, %c0_59] : memref<1x4xf32, #tpu.memory_space<vmem>>, vector<1x4xf32>
    %251 = vector.broadcast %250 : vector<1x4xf32> to vector<8x4xf32>
    %252 = arith.addf %249, %251 : vector<8x4xf32>
    %253 = arith.negf %252 : vector<8x4xf32>
    %254 = math.exp %253 : vector<8x4xf32>
    %cst_60 = arith.constant 1.000000e+00 : f32
    %255 = vector.broadcast %cst_60 : f32 to vector<8x4xf32>
    %256 = arith.addf %255, %254 : vector<8x4xf32>
    %257 = arith.divf %255, %256 : vector<8x4xf32>
    %c0_61 = arith.constant 0 : index
    %c0_62 = arith.constant 0 : index
    %258 = vector.load %arg7[%c0_61, %c0_62] : memref<8x4xf32, #tpu.memory_space<vmem>>, vector<8x4xf32>
    tpu.vector_store %arg7[%c0_61, %c0_62], %257 {strides = array<i32>} : memref<8x4xf32, #tpu.memory_space<vmem>>, vector<8x4xf32>,
    return
  }
  func.func @transform_0(%arg0: i32) -> (i32, i32, i32) {
    %c0_i32 = arith.constant 0 : i32
    %c0_i32_0 = arith.constant 0 : i32
    %c0_i32_1 = arith.constant 0 : i32
    return %c0_i32, %arg0, %c0_i32_0 : i32, i32, i32
  }
  func.func @transform_1(%arg0: i32) -> (i32, i32) {
    %c0_i32 = arith.constant 0 : i32
    %c0_i32_0 = arith.constant 0 : i32
    %c0_i32_1 = arith.constant 0 : i32
    return %c0_i32, %c0_i32_0 : i32, i32
  }
  func.func @transform_2(%arg0: i32) -> (i32, i32) {
    %c0_i32 = arith.constant 0 : i32
    %c0_i32_0 = arith.constant 0 : i32
    %c0_i32_1 = arith.constant 0 : i32
    return %c0_i32, %c0_i32_0 : i32, i32
  }
  func.func @transform_3(%arg0: i32) -> (i32, i32) {
    %c0_i32 = arith.constant 0 : i32
    %c0_i32_0 = arith.constant 0 : i32
    %c0_i32_1 = arith.constant 0 : i32
    return %c0_i32, %c0_i32_0 : i32, i32
  }
  func.func @transform_4(%arg0: i32) -> (i32, i32) {
    %c0_i32 = arith.constant 0 : i32
    %c0_i32_0 = arith.constant 0 : i32
    %c0_i32_1 = arith.constant 0 : i32
    return %c0_i32, %c0_i32_0 : i32, i32
  }
  func.func @transform_5(%arg0: i32) -> (i32, i32) {
    %c0_i32 = arith.constant 0 : i32
    %c0_i32_0 = arith.constant 0 : i32
    %c0_i32_1 = arith.constant 0 : i32
    return %c0_i32, %c0_i32_0 : i32, i32
  }
  func.func @transform_6(%arg0: i32) -> (i32, i32) {
    %c0_i32 = arith.constant 0 : i32
    %c0_i32_0 = arith.constant 0 : i32
    return %arg0, %c0_i32 : i32, i32
  }
}

</mosaic_0001>

<bundles_post_ra>
// kernel: tpu_custom_call.1
= control target key start
LH: loop header
LB: loop body
LE: loop exit
PB: predicated region body
PF: predicated region fallthrough
CT: control target
= control target key end

     0   :  { %11 = vsyncpa [#allocation3], 0  ;;  %s1366_s21 = smov [#allocation2]   ;;  %s1557_s0 = inlined_call_operand.hbm [shape: f32[8,8,128], index: 0, kind: input, shape index: {}]   ;;  %s1558_s1 = inlined_call_operand.vmem [shape: f32[32,128], index: 1, kind: input, shape index: {}]   ;;  %s1559_s2 = inlined_call_operand.vmem [shape: f32[32,5], index: 2, kind: input, shape index: {}]   ;;  %s1560_s3 = inlined_call_operand.vmem [shape: f32[1,5], index: 3, kind: input, shape index: {}]   ;;  %s1561_s4 = inlined_call_operand.vmem [shape: f32[5,4], index: 4, kind: input, shape index: {}]   ;;  %s1562_s5 = inlined_call_operand.vmem [shape: f32[1,4], index: 5, kind: input, shape index: {}]   ;;  %s1563_s6 = inlined_call_operand.vmem [shape: f32[8,4], index: 6, kind: output, shape index: {}]  }
   0x1   :  { %s17_s22 = sshll.u32 %s1366_s21, 4  ;;  %s1342_s25 = scalar_lea.hbm %s1557_s0, 1024  ;;  %s18_s22 = int_to_ptr.vmem [resolvable:$true] %s17_s22 }
   0x2   :  { %p1343_p0 = scmp.ne.s32.totalorder %s1557_s0, %s1342_s25  ;;  %p1346_p1 = scmp.lt.u32.totalorder %s1342_s25, %s1557_s0 }
   0x4   :  { %p1348_p2 = pnand %p1346_p1, %p1343_p0 }
   0x6   :  { %1351 = shalt.err (!%p1348_p2)
}
   0x7   :  { %s1352_s30 = scalar_lea.vmem %s18_s22, 1024  ;;  %p1357_p4 = scmp.lt.s32.totalorder %s18_s22, %s18_s22 }
   0x8   :  { %p1353_p3 = scmp.ne.s32.totalorder %s18_s22, %s1352_s30  ;;  %p1358_p5 = scmp.lt.s32.totalorder %s1352_s30, %s1352_s30 }
   0xa   :  { %p1359_p6 = por %p1358_p5, %p1357_p4 }
   0xc   :  { %p1360_p7 = pnand %p1359_p6, %p1353_p3 }
   0xe   :  { %1363 = shalt.err (!%p1360_p7)
}
   0xf   :  { %s1367_s7 = smov 128   ;;  %s1368_s8 = smov 8  }
  0x10   :  { %23 = dma.hbm_to_vmem [thread:$0]  %s1557_s0, 1024, %s18_s22, [#allocation3], %s1367_s7, %s1367_s7, %s1368_s8  }
  0x11   :  { %1364 = dma.done.wait [#allocation3], 1024  }
  0x12   :  { %1365 = vsyncadd [#allocation3], 4294966272  ;;  %v1369_v0 = vmov 0.0|0.0   ;;  %vm1370_vm0 = vmmov 0   ;;  %v1371_v1 = vmov 0.0   ;;  %v37_v2 = vld [vmem:[%s1558_s1] sm:$0xff] }
  0x13   :  { %1212 = vmatprep.subr.bf16.mxu0 %v1369_v0  ;;  %1116 = vmatprep.mubr.msk.f32.mxu0 %vm1370_vm0, %v1371_v1  ;;  %v38_v3 = vld [vmem:[%s1558_s1 + $0x8] sm:$0xff]  ;;  %v39_v4 = vld [vmem:[%s1558_s1 + $0x10] sm:$0xff]  ;;  %v40_v6 = vld [vmem:[%s1558_s1 + $0x18] sm:$0xff]  ;;  %s1372_s1 = smov 64   ;;  %s1373_s18 = smov 32   ;;  %vm42_vm1 = vcmask 261120  }
  0x14   :  { %1218 = vmatprep.subr.bf16.mxu1 %v1369_v0  ;;  %1127 = vmatprep.mubr.msk.f32.mxu1 %vm1370_vm0, %v1371_v1  ;;  %v1436_v5 = vpack.c.bf16 %v38_v3, %v37_v2  ;;  %v1442_v7 = vpack.c.bf16 %v40_v6, %v39_v4  ;;  %v41_v8 = vld [vmem:[#allocation2] sm:$0xff]  ;;  %v142_v26 = vld [vmem:[#allocation2 + $0x8] sm:$0xff]  ;;  %v244_v44 = vld [vmem:[#allocation2 + $0x10] sm:$0xff]  ;;  %vm953_vm2 = vcmask 1044480   ;;  %vm949_vm3 = vcmask 39936  }
  0x15   :  { %v346_v62 = vld [vmem:[#allocation2 + $0x18] sm:$0xff]  ;;  %vm1033_vm4 = vcmask 31744  }
  0x16   :  { %1214 = vmatpush3.bf16.msra.mxu0 %v1436_v5  ;;  %1220 = vmatpush3.bf16.msra.mxu1 %v1436_v5 }
  0x17   :  { %1215 = vmatprep.subr.bf16.mxu0 %v1369_v0  ;;  %1221 = vmatprep.subr.bf16.mxu1 %v1369_v0 }
  0x1a   :  { %1217 = vmatpush3.bf16.msra.mxu0 %v1442_v7  ;;  %1223 = vmatpush3.bf16.msra.mxu1 %v1442_v7 }
  0x1b   :  { %1224 = vmatprep.subr.bf16.mxu0 %v1369_v0  ;;  %1230 = vmatprep.subr.bf16.mxu1 %v1369_v0 }
  0x1d   :  { %1117 = vmatmul.mubr.f32.vlgmr.msra.gmra.mrb[0].mxu0 %v1371_v1 }
  0x1e   :  { %1226 = vmatpush3.bf16.msra.mxu0 %v1436_v5  ;;  %1138 = vmatprep.mubr.msk.f32.mxu0 %vm1370_vm0, %v1371_v1 }
  0x1f   :  { %1227 = vmatprep.subr.bf16.mxu0 %v1369_v0 }
  0x22   :  { %1229 = vmatpush3.bf16.msra.mxu0 %v1442_v7 }
  0x23   :  { %1236 = vmatprep.subr.bf16.mxu0 %v1369_v0 }
  0xf0   :  { %v112_v9 = vpop.f32.mrb[0].mxu0 }
  0xf1   :  { %v116_v10 = vadd.f32 %v112_v9, %v41_v8  ;;  %v1118_v11 = vpop.f32.mrb[1].mxu0 }
  0xf3   :  { %1274 = vtanh.f32 %v116_v10  ;;  %v1040_v13 = vmul.f32 -1.442695, %v116_v10 }
  0xf5   :  { %1276 = vpow2.f32 %v1040_v13 }
  0xfd   :  { %v1275_v12 = vpop.eup %1274 }
  0xfe   :  { %126 = vrot.lane.b32.xlu0 %v1275_v12, %s1372_s1 }
  0xff   :  { %v1277_v14 = vpop.eup %1276 }
 0x100   :  { %v120_v15 = vadd.f32 1.0, %v1277_v14 }
 0x102   :  { %1278 = vrcp.f32 %v120_v15 }
 0x10c   :  { %v1279_v16 = vpop.eup %1278 }
 0x10d   :  { %v124_v19 = vmul.f32 0.0, %v1279_v16 }
 0x170   :  { %v127_v17 = vpop.permute.xlu0 %126 }
 0x171   :  { %v129_v18 = vmul.f32 %v1279_v16, %v127_v17 }
 0x173   :  { %131 = vrot.lane.b32.xlu0 %v129_v18, %s1373_s18 }
 0x1e5   :  { %v132_v20 = vpop.permute.xlu0 %131 }
 0x1e6   :  { %v134_v21 = vadd.f32 %v132_v20, %v124_v19  ;;  %v448_v20 = vld [vmem:[#allocation2 + $0x20] sm:$0xff] }
 0x1e8   :  { %1280 = vtanh.f32 %v134_v21 }
 0x1f2   :  { %v1281_v22 = vpop.eup %1280 }
 0x1f3   :  { %137 = vrot.lane.b32.xlu1 %v1281_v22, %s1372_s1 }
 0x265   :  { %v138_v23 = vpop.permute.xlu1 %137 }
 0x266   :  { %v140_v24 = vmul.f32 %v1279_v16, %v138_v23 }
 0x268   :  { %144 = vrot.lane.b32.xlu1 %v140_v24, %s1373_s18 }
 0x2da   :  { %v145_v25 = vpop.permute.xlu1 %144 }
 0x2db   :  { %1128 = vmatmul.mubr.msk.f32.vlgmr.msra.gmra.mrb[0].mxu1 %vm42_vm1, %v145_v25 }
 0x2dc   :  { %1232 = vmatpush3.bf16.msra.mxu1 %v1436_v5  ;;  %1149 = vmatprep.mubr.msk.f32.mxu1 %vm1370_vm0, %v1371_v1 }
 0x2dd   :  { %1233 = vmatprep.subr.bf16.mxu1 %v1369_v0 }
 0x2e0   :  { %1235 = vmatpush3.bf16.msra.mxu1 %v1442_v7 }
 0x2e1   :  { %1242 = vmatprep.subr.bf16.mxu1 %v1369_v0 }
 0x3ae   :  { %v214_v27 = vpop.f32.mrb[0].mxu1 }
 0x3af   :  { %v218_v28 = vadd.f32 %v214_v27, %v142_v26  ;;  %v1129_v29 = vpop.f32.mrb[1].mxu1 }
 0x3b1   :  { %1282 = vtanh.f32 %v218_v28  ;;  %v1042_v31 = vmul.f32 -1.442695, %v218_v28 }
 0x3b3   :  { %1284 = vpow2.f32 %v1042_v31 }
 0x3bb   :  { %v1283_v30 = vpop.eup %1282 }
 0x3bc   :  { %228 = vrot.lane.b32.xlu0 %v1283_v30, %s1372_s1 }
 0x3bd   :  { %v1285_v32 = vpop.eup %1284 }
 0x3be   :  { %v222_v33 = vadd.f32 1.0, %v1285_v32 }
 0x3c0   :  { %1286 = vrcp.f32 %v222_v33 }
 0x3ca   :  { %v1287_v34 = vpop.eup %1286 }
 0x3cb   :  { %v226_v37 = vmul.f32 %v1287_v34, %v134_v21 }
 0x42e   :  { %v229_v35 = vpop.permute.xlu0 %228 }
 0x42f   :  { %v231_v36 = vmul.f32 %v1287_v34, %v229_v35 }
 0x431   :  { %233 = vrot.lane.b32.xlu1 %v231_v36, %s1373_s18 }
 0x4a3   :  { %v234_v38 = vpop.permute.xlu1 %233 }
 0x4a4   :  { %v236_v39 = vadd.f32 %v234_v38, %v226_v37  ;;  %v550_v38 = vld [vmem:[#allocation2 + $0x28] sm:$0xff] }
 0x4a6   :  { %1288 = vtanh.f32 %v236_v39 }
 0x4b0   :  { %v1289_v40 = vpop.eup %1288 }
 0x4b1   :  { %239 = vrot.lane.b32.xlu0 %v1289_v40, %s1372_s1 }
 0x523   :  { %v240_v41 = vpop.permute.xlu0 %239 }
 0x524   :  { %v242_v42 = vmul.f32 %v1287_v34, %v240_v41 }
 0x526   :  { %246 = vrot.lane.b32.xlu1 %v242_v42, %s1373_s18 }
 0x598   :  { %v247_v43 = vpop.permute.xlu1 %246 }
 0x599   :  { %1139 = vmatmul.mubr.msk.f32.vlgmr.msra.gmra.mrb[2].mxu0 %vm42_vm1, %v247_v43 }
 0x59a   :  { %1238 = vmatpush3.bf16.msra.mxu0 %v1436_v5  ;;  %1160 = vmatprep.mubr.msk.f32.mxu0 %vm1370_vm0, %v1371_v1 }
 0x59b   :  { %1239 = vmatprep.subr.bf16.mxu0 %v1369_v0 }
 0x59e   :  { %1241 = vmatpush3.bf16.msra.mxu0 %v1442_v7 }
 0x59f   :  { %1248 = vmatprep.subr.bf16.mxu0 %v1369_v0 }
 0x66c   :  { %v316_v45 = vpop.f32.mrb[2].mxu0 }
 0x66d   :  { %v320_v46 = vadd.f32 %v316_v45, %v244_v44  ;;  %v1140_v47 = vpop.f32.mrb[3].mxu0 }
 0x66f   :  { %1290 = vtanh.f32 %v320_v46  ;;  %v1044_v49 = vmul.f32 -1.442695, %v320_v46 }
 0x671   :  { %1292 = vpow2.f32 %v1044_v49 }
 0x679   :  { %v1291_v48 = vpop.eup %1290 }
 0x67a   :  { %330 = vrot.lane.b32.xlu0 %v1291_v48, %s1372_s1 }
 0x67b   :  { %v1293_v50 = vpop.eup %1292 }
 0x67c   :  { %v324_v51 = vadd.f32 1.0, %v1293_v50 }
 0x67e   :  { %1294 = vrcp.f32 %v324_v51 }
 0x688   :  { %v1295_v52 = vpop.eup %1294 }
 0x689   :  { %v328_v55 = vmul.f32 %v1295_v52, %v236_v39 }
 0x6ec   :  { %v331_v53 = vpop.permute.xlu0 %330 }
 0x6ed   :  { %v333_v54 = vmul.f32 %v1295_v52, %v331_v53 }
 0x6ef   :  { %335 = vrot.lane.b32.xlu1 %v333_v54, %s1373_s18  ;;  %v652_v54 = vld [vmem:[#allocation2 + $0x30] sm:$0xff] }
 0x761   :  { %v336_v56 = vpop.permute.xlu1 %335 }
 0x762   :  { %v338_v57 = vadd.f32 %v336_v56, %v328_v55 }
 0x764   :  { %1296 = vtanh.f32 %v338_v57 }
 0x76e   :  { %v1297_v58 = vpop.eup %1296 }
 0x76f   :  { %341 = vrot.lane.b32.xlu0 %v1297_v58, %s1372_s1 }
 0x7e1   :  { %v342_v59 = vpop.permute.xlu0 %341 }
 0x7e2   :  { %v344_v60 = vmul.f32 %v1295_v52, %v342_v59 }
 0x7e4   :  { %348 = vrot.lane.b32.xlu1 %v344_v60, %s1373_s18 }
 0x856   :  { %v349_v61 = vpop.permute.xlu1 %348 }
 0x857   :  { %1150 = vmatmul.mubr.msk.f32.vlgmr.msra.gmra.mrb[2].mxu1 %vm42_vm1, %v349_v61 }
 0x858   :  { %1244 = vmatpush3.bf16.msra.mxu1 %v1436_v5  ;;  %1171 = vmatprep.mubr.msk.f32.mxu1 %vm1370_vm0, %v1371_v1 }
 0x859   :  { %1245 = vmatprep.subr.bf16.mxu1 %v1369_v0 }
 0x85c   :  { %1247 = vmatpush3.bf16.msra.mxu1 %v1442_v7 }
 0x85d   :  { %1254 = vmatprep.subr.bf16.mxu1 %v1369_v0 }
 0x92a   :  { %v418_v63 = vpop.f32.mrb[2].mxu1 }
 0x92b   :  { %v422_v2 = vadd.f32 %v418_v63, %v346_v62  ;;  %v1151_v3 = vpop.f32.mrb[3].mxu1 }
 0x92d   :  { %1298 = vtanh.f32 %v422_v2  ;;  %v1046_v6 = vmul.f32 -1.442695, %v422_v2 }
 0x92f   :  { %1300 = vpow2.f32 %v1046_v6 }
 0x937   :  { %v1299_v4 = vpop.eup %1298 }
 0x938   :  { %432 = vrot.lane.b32.xlu0 %v1299_v4, %s1372_s1 }
 0x939   :  { %v1301_v8 = vpop.eup %1300 }
 0x93a   :  { %v426_v9 = vadd.f32 1.0, %v1301_v8 }
 0x93c   :  { %1302 = vrcp.f32 %v426_v9 }
 0x946   :  { %v1303_v10 = vpop.eup %1302 }
 0x947   :  { %v430_v13 = vmul.f32 %v1303_v10, %v338_v57 }
 0x9aa   :  { %v433_v11 = vpop.permute.xlu0 %432 }
 0x9ab   :  { %v435_v12 = vmul.f32 %v1303_v10, %v433_v11 }
 0x9ad   :  { %437 = vrot.lane.b32.xlu1 %v435_v12, %s1373_s18  ;;  %v754_v12 = vld [vmem:[#allocation2 + $0x38] sm:$0xff] }
 0xa1f   :  { %v438_v14 = vpop.permute.xlu1 %437 }
 0xa20   :  { %v440_v15 = vadd.f32 %v438_v14, %v430_v13 }
 0xa22   :  { %1304 = vtanh.f32 %v440_v15 }
 0xa2c   :  { %v1305_v16 = vpop.eup %1304 }
 0xa2d   :  { %443 = vrot.lane.b32.xlu0 %v1305_v16, %s1372_s1 }
 0xa9f   :  { %v444_v17 = vpop.permute.xlu0 %443 }
 0xaa0   :  { %v446_v18 = vmul.f32 %v1303_v10, %v444_v17 }
 0xaa2   :  { %450 = vrot.lane.b32.xlu1 %v446_v18, %s1373_s18 }
 0xb14   :  { %v451_v19 = vpop.permute.xlu1 %450 }
 0xb15   :  { %1161 = vmatmul.mubr.msk.f32.vlgmr.msra.gmra.mrb[4].mxu0 %vm42_vm1, %v451_v19 }
 0xb16   :  { %1250 = vmatpush3.bf16.msra.mxu0 %v1436_v5  ;;  %1182 = vmatprep.mubr.msk.f32.mxu0 %vm1370_vm0, %v1371_v1 }
 0xb17   :  { %1251 = vmatprep.subr.bf16.mxu0 %v1369_v0 }
 0xb1a   :  { %1253 = vmatpush3.bf16.msra.mxu0 %v1442_v7 }
 0xb1b   :  { %1260 = vmatprep.subr.bf16.mxu0 %v1369_v0 }
 0xbe8   :  { %v520_v21 = vpop.f32.mrb[4].mxu0 }
 0xbe9   :  { %v524_v22 = vadd.f32 %v520_v21, %v448_v20  ;;  %v1162_v23 = vpop.f32.mrb[5].mxu0 }
 0xbeb   :  { %1306 = vtanh.f32 %v524_v22  ;;  %v1048_v25 = vmul.f32 -1.442695, %v524_v22 }
 0xbed   :  { %1308 = vpow2.f32 %v1048_v25  ;;  %v855_v25 = vld [vmem:[%s1559_s2] sm:$0xff] }
 0xbf5   :  { %v1307_v24 = vpop.eup %1306 }
 0xbf6   :  { %534 = vrot.lane.b32.xlu0 %v1307_v24, %s1372_s1 }
 0xbf7   :  { %v1309_v26 = vpop.eup %1308 }
 0xbf8   :  { %v528_v27 = vadd.f32 1.0, %v1309_v26  ;;  %v856_v26 = vld [vmem:[%s1559_s2 + $0x8] sm:$0xff] }
 0xbfa   :  { %1310 = vrcp.f32 %v528_v27  ;;  %v857_v27 = vld [vmem:[%s1559_s2 + $0x10] sm:$0xff] }
 0xc04   :  { %v1311_v28 = vpop.eup %1310 }
 0xc05   :  { %v532_v31 = vmul.f32 %v1311_v28, %v440_v15 }
 0xc68   :  { %v535_v29 = vpop.permute.xlu0 %534 }
 0xc69   :  { %v537_v30 = vmul.f32 %v1311_v28, %v535_v29  ;;  %v858_v29 = vld [vmem:[%s1559_s2 + $0x18] sm:$0xff] }
 0xc6b   :  { %539 = vrot.lane.b32.xlu1 %v537_v30, %s1373_s18  ;;  %v1264_v30 = vpack.c.bf16 %v858_v29, %v857_v27 }
 0xcdd   :  { %v540_v32 = vpop.permute.xlu1 %539 }
 0xcde   :  { %v542_v33 = vadd.f32 %v540_v32, %v532_v31  ;;  %v941_v32 = vld [vmem:[%s1561_s4] sm:$0x1f] }
 0xce0   :  { %1312 = vtanh.f32 %v542_v33 }
 0xcea   :  { %v1313_v34 = vpop.eup %1312 }
 0xceb   :  { %545 = vrot.lane.b32.xlu0 %v1313_v34, %s1372_s1 }
 0xd5d   :  { %v546_v35 = vpop.permute.xlu0 %545 }
 0xd5e   :  { %v548_v36 = vmul.f32 %v1311_v28, %v546_v35  ;;  %v1261_v28 = vpack.c.bf16 %v856_v26, %v855_v25 }
 0xd60   :  { %552 = vrot.lane.b32.xlu1 %v548_v36, %s1373_s18 }
 0xdd2   :  { %v553_v37 = vpop.permute.xlu1 %552 }
 0xdd3   :  { %1172 = vmatmul.mubr.msk.f32.vlgmr.msra.gmra.mrb[4].mxu1 %vm42_vm1, %v553_v37 }
 0xdd4   :  { %1256 = vmatpush3.bf16.msra.mxu1 %v1436_v5  ;;  %1193 = vmatprep.mubr.msk.f32.mxu1 %vm1370_vm0, %v1371_v1 }
 0xdd5   :  { %1257 = vmatprep.subr.bf16.mxu1 %v1369_v0 }
 0xdd8   :  { %1259 = vmatpush3.bf16.msra.mxu1 %v1442_v7 }
 0xdd9   :  { %1207 = vmatprep.subr.mxu1 %v1371_v1 }
 0xea6   :  { %v622_v39 = vpop.f32.mrb[4].mxu1 }
 0xea7   :  { %v626_v40 = vadd.f32 %v622_v39, %v550_v38  ;;  %v1173_v41 = vpop.f32.mrb[5].mxu1  ;;  %v1057_v39 = vld [vmem:[%s1562_s5] ss:$0 sm:$0xff] }
 0xea9   :  { %1314 = vtanh.f32 %v626_v40  ;;  %v1050_v43 = vmul.f32 -1.442695, %v626_v40 }
 0xeab   :  { %1316 = vpow2.f32 %v1050_v43 }
 0xeb3   :  { %v1315_v42 = vpop.eup %1314 }
 0xeb4   :  { %636 = vrot.lane.b32.xlu0 %v1315_v42, %s1372_s1 }
 0xeb5   :  { %v1317_v5 = vpop.eup %1316 }
 0xeb6   :  { %v630_v44 = vadd.f32 1.0, %v1317_v5 }
 0xeb8   :  { %1318 = vrcp.f32 %v630_v44 }
 0xec2   :  { %v1319_v45 = vpop.eup %1318 }
 0xec3   :  { %v634_v7 = vmul.f32 %v1319_v45, %v542_v33 }
 0xf26   :  { %v637_v46 = vpop.permute.xlu0 %636 }
 0xf27   :  { %v639_v47 = vmul.f32 %v1319_v45, %v637_v46 }
 0xf29   :  { %641 = vrot.lane.b32.xlu1 %v639_v47, %s1373_s18 }
 0xf9b   :  { %v642_v48 = vpop.permute.xlu1 %641 }
 0xf9c   :  { %v644_v49 = vadd.f32 %v642_v48, %v634_v7 }
 0xf9e   :  { %1320 = vtanh.f32 %v644_v49 }
 0xfa8   :  { %v1321_v50 = vpop.eup %1320 }
 0xfa9   :  { %647 = vrot.lane.b32.xlu0 %v1321_v50, %s1372_s1 }
0x101b   :  { %v648_v51 = vpop.permute.xlu0 %647 }
0x101c   :  { %v650_v52 = vmul.f32 %v1319_v45, %v648_v51 }
0x101e   :  { %654 = vrot.lane.b32.xlu1 %v650_v52, %s1373_s18 }
0x1090   :  { %v655_v53 = vpop.permute.xlu1 %654 }
0x1091   :  { %1183 = vmatmul.mubr.msk.f32.vlgmr.msra.gmra.mrb[6].mxu0 %vm42_vm1, %v655_v53 }
0x1092   :  { %1204 = vmatprep.mubr.msk.f32.mxu0 %vm1370_vm0, %v1371_v1  ;;  %1262 = vmatpush3.bf16.msra.mxu0 %v1261_v28 }
0x1093   :  { %1263 = vmatprep.subr.bf16.mxu0 %v1369_v0  ;;  %v1055_v0 = vld [vmem:[%s1560_s3] ss:$0 sm:$0xff] }
0x1096   :  { %1265 = vmatpush3.bf16.msra.mxu0 %v1264_v30 }
0x1164   :  { %v724_v55 = vpop.f32.mrb[6].mxu0 }
0x1165   :  { %v728_v56 = vadd.f32 %v724_v55, %v652_v54  ;;  %v1184_v57 = vpop.f32.mrb[7].mxu0 }
0x1167   :  { %1322 = vtanh.f32 %v728_v56  ;;  %v1052_v59 = vmul.f32 -1.442695, %v728_v56 }
0x1169   :  { %1324 = vpow2.f32 %v1052_v59 }
0x1171   :  { %v1323_v58 = vpop.eup %1322 }
0x1172   :  { %738 = vrot.lane.b32.xlu0 %v1323_v58, %s1372_s1 }
0x1173   :  { %v1325_v60 = vpop.eup %1324 }
0x1174   :  { %v732_v61 = vadd.f32 1.0, %v1325_v60 }
0x1176   :  { %1326 = vrcp.f32 %v732_v61 }
0x1180   :  { %v1327_v62 = vpop.eup %1326 }
0x1181   :  { %v736_v3 = vmul.f32 %v1327_v62, %v644_v49 }
0x11e4   :  { %v739_v63 = vpop.permute.xlu0 %738 }
0x11e5   :  { %v741_v2 = vmul.f32 %v1327_v62, %v739_v63 }
0x11e7   :  { %743 = vrot.lane.b32.xlu1 %v741_v2, %s1373_s18 }
0x1259   :  { %v744_v4 = vpop.permute.xlu1 %743 }
0x125a   :  { %v746_v6 = vadd.f32 %v744_v4, %v736_v3 }
0x125c   :  { %1328 = vtanh.f32 %v746_v6 }
0x1266   :  { %v1329_v8 = vpop.eup %1328 }
0x1267   :  { %749 = vrot.lane.b32.xlu0 %v1329_v8, %s1372_s1 }
0x12d9   :  { %v750_v9 = vpop.permute.xlu0 %749 }
0x12da   :  { %v752_v10 = vmul.f32 %v1327_v62, %v750_v9 }
0x12dc   :  { %756 = vrot.lane.b32.xlu1 %v752_v10, %s1373_s18 }
0x134e   :  { %v757_v11 = vpop.permute.xlu1 %756 }
0x134f   :  { %1194 = vmatmul.mubr.msk.f32.vlgmr.msra.gmra.mrb[6].mxu1 %vm42_vm1, %v757_v11 }
0x1350   :  { %1209 = vmatprep.mubr.msk.f32.mxu1 %vm1370_vm0, %v1371_v1  ;;  %1208 = vmatpush3.msk.msra.mxu1 %vm953_vm2, %v941_v32 }
0x1422   :  { %v826_v13 = vpop.f32.mrb[6].mxu1 }
0x1423   :  { %v830_v14 = vadd.f32 %v826_v13, %v754_v12  ;;  %v1195_v15 = vpop.f32.mrb[7].mxu1 }
0x1425   :  { %1330 = vtanh.f32 %v830_v14  ;;  %v1054_v17 = vmul.f32 -1.442695, %v830_v14 }
0x1427   :  { %1332 = vpow2.f32 %v1054_v17 }
0x142f   :  { %v1331_v16 = vpop.eup %1330 }
0x1430   :  { %840 = vrot.lane.b32.xlu0 %v1331_v16, %s1372_s1 }
0x1431   :  { %v1333_v18 = vpop.eup %1332 }
0x1432   :  { %v834_v19 = vadd.f32 1.0, %v1333_v18 }
0x1434   :  { %1334 = vrcp.f32 %v834_v19 }
0x143e   :  { %v1335_v20 = vpop.eup %1334 }
0x143f   :  { %v838_v23 = vmul.f32 %v1335_v20, %v746_v6 }
0x14a2   :  { %v841_v21 = vpop.permute.xlu0 %840 }
0x14a3   :  { %v843_v22 = vmul.f32 %v1335_v20, %v841_v21 }
0x14a5   :  { %845 = vrot.lane.b32.xlu1 %v843_v22, %s1373_s18 }
0x1517   :  { %v846_v1 = vpop.permute.xlu1 %845 }
0x1518   :  { %v848_v24 = vadd.f32 %v846_v1, %v838_v23 }
0x151a   :  { %1336 = vtanh.f32 %v848_v24 }
0x1524   :  { %v1337_v31 = vpop.eup %1336 }
0x1525   :  { %851 = vrot.lane.b32.xlu0 %v1337_v31, %s1372_s1 }
0x1597   :  { %v852_v33 = vpop.permute.xlu0 %851 }
0x1598   :  { %v854_v34 = vmul.f32 %v1335_v20, %v852_v33 }
0x159a   :  { %867 = vrot.lane.b32.xlu1 %v854_v34, %s1373_s18 }
0x160c   :  { %v868_v35 = vpop.permute.xlu1 %867 }
0x160d   :  { %1205 = vmatmul.mubr.msk.f32.vlgmr.msra.gmra.mrb[8].mxu0 %vm42_vm1, %v868_v35 }
0x16e0   :  { %v937_v36 = vpop.f32.mrb[8].mxu0 }
0x16e1   :  { %v938_v37 = vadd.f32 %v1055_v0, %v937_v36  ;;  %v1206_v38 = vpop.f32.mrb[9].mxu0 }
0x16e3   :  { %1210 = vmatmul.mubr.msk.f32.vlgmr.msra.gmra.mrb[8].mxu1 %vm949_vm3, %v938_v37 }
0x17b6   :  { %v1023_v40 = vpop.f32.mrb[8].mxu1 }
0x17b7   :  { %v1024_v41 = vadd.f32 %v1057_v39, %v1023_v40  ;;  %v1211_v42 = vpop.f32.mrb[9].mxu1 }
0x17b9   :  { %v1060_v43 = vmul.f32 -1.442695, %v1024_v41 }
0x17bb   :  { %1338 = vpow2.f32 %v1060_v43 }
0x17c5   :  { %v1339_v5 = vpop.eup %1338 }
0x17c6   :  { %v1030_v44 = vadd.f32 1.0, %v1339_v5 }
0x17c8   :  { %1340 = vrcp.f32 %v1030_v44 }
0x17d2   :  { %v1341_v45 = vpop.eup %1340 }
0x17d3   :  { %1034 = vst.msk [vmem:[%s1563_s6] sm:$0xff] %vm1033_vm4, %v1341_v45 }
0x17d4   :  { %1039 = vsyncpa [#allocation3], 1 }

</bundles_post_ra>
